<compile_context>
chip_gen: v7x
topology: tpu7x:2x2x1
jax: 0.10.0
libtpu: 0.0.40
codegen_flags: <defaults>
</compile_context>

<pallas_src>
import math

import jax
import jax.numpy as jnp
from jax import lax
from jax.experimental import pallas as pl
from jax.experimental.pallas import tpu as pltpu


def _round_up(x, m):
    return ((x + m - 1) // m) * m


def _cdiv(a, b):
    return (a + b - 1) // b


def _mlp_kernel(x_ref, w1_ref, b1_ref, w2_ref, b2_ref, o_ref):
    """One batch tile of Network.forward (feature-major compute).

    x_ref  : (TB, nSite)  input tile in natural layout (contiguous HBM rows)
    w1_ref : (H, nSite)   hidden1.weight (torch layout), VMEM-resident
    b1_ref : (H, 1)       hidden1.bias as a column
    w2_ref : (H, 1)       output.weight as a column
    b2_ref : (1, 1)       output.bias, SMEM scalar
    o_ref  : (1, TB)      lane-dense output tile (batch on the lane axis)
    """
    # Layer 1 on the MXU, contracting over nSite without materializing x^T:
    # (H, nSite) x (TB, nSite) -> (H, TB).  Batch lands on the lane axis, so
    # both the intermediate and the final store are fully lane-utilized.
    h = lax.dot_general(
        w1_ref[...], x_ref[...],
        dimension_numbers=(((1,), (1,)), ((), ())),
        preferred_element_type=jnp.float32,
        precision=lax.Precision.HIGHEST,
    )
    h = jnp.maximum(h + b1_ref[...], 0.0)

    # Layer 2 (N=1): VPU multiply + sublane reduce instead of spending a whole
    # MXU pass to produce a single useful column.
    y = jnp.sum(h * w2_ref[...], axis=0, keepdims=True)        # (1, TB)
    y = y + b2_ref[0, 0]                                        # scalar bias (SMEM)
    o_ref[...] = jnp.maximum(y, 0.0).astype(o_ref.dtype)


def network_forward(x, w1, b1, w2, b2, *, tile_b=8192):
    """Network forward.

    x  : (B, nSite) float32   (natural layout -- no transpose, no pad)
    w1 : (H, nSite)  == hidden1.weight (torch layout)
    b1 : (H, 1)      == hidden1.bias as a column
    w2 : (H, 1)      == output.weight transposed to a column
    b2 : (1, 1)      == output.bias
    returns (B, 1) float32
    """
    B, n_site = x.shape
    H = w1.shape[0]
    lane = 128

    # Lane-aligned batch tile.  Big tiles amortize per-step pipeline overhead;
    # cap so batches >= 2 lanes always get >= 2 grid steps (v7x: 2 TensorCores
    # share the "parallel" batch axis).
    b128 = _round_up(max(B, 1), lane)
    tb = min(_round_up(tile_b, lane), b128)
    if b128 >= 2 * lane:
        tb = min(tb, _round_up(_cdiv(b128, 2), lane))
    n_tiles = _cdiv(B, tb)
    out_cols = n_tiles * tb   # only the tiny output is padded, never x

    cost = pl.CostEstimate(
        flops=2 * H * n_site * B + 2 * H * B,
        transcendentals=0,
        bytes_accessed=B * n_site * 4 + B * 4 + (H * n_site + 2 * H + 1) * 4,
    )

    out = pl.pallas_call(
        _mlp_kernel,
        out_shape=jax.ShapeDtypeStruct((1, out_cols), jnp.float32),
        grid=(n_tiles,),
        in_specs=[
            pl.BlockSpec((tb, n_site), lambda i: (i, 0)),   # stream x row-tiles
            pl.BlockSpec((H, n_site), lambda i: (0, 0)),    # weights stay resident
            pl.BlockSpec((H, 1), lambda i: (0, 0)),
            pl.BlockSpec((H, 1), lambda i: (0, 0)),
            pl.BlockSpec(memory_space=pltpu.MemorySpace.SMEM),  # scalar output bias
        ],
        out_specs=pl.BlockSpec((1, tb), lambda i: (0, i)),  # lane-dense store
        compiler_params=pltpu.CompilerParams(
            dimension_semantics=("parallel",),   # independent batch tiles
            vmem_limit_bytes=32 * 1024 * 1024,   # explicit; fits v5e/v6e/v7x budgets
        ),
        cost_estimate=cost,
    )(x, w1, b1, w2, b2)

    return out[0, :B].reshape(B, 1)


def init_params(key, n_site):
    """Deterministic init mirroring the PyTorch module's __init__.

    hidden1.weight: kaiming_uniform_(nonlinearity='relu'),
                    bound = sqrt(2) * sqrt(3 / fan_in), fan_in = nSite
    hidden1.bias  : default Linear init, U(-1/sqrt(fan_in), 1/sqrt(fan_in))
    output.weight : xavier_uniform_, bound = sqrt(6 / (fan_in + fan_out))
    output.bias   : default Linear init
    Returned in the layouts the kernel consumes:
      w1 (H, nSite), b1 (H, 1), w2 (H, 1), b2 (1, 1).
    """
    H = n_site
    k1, k2, k3, k4 = jax.random.split(key, 4)

    kaiming_bound = math.sqrt(2.0) * math.sqrt(3.0 / n_site)
    w1 = jax.random.uniform(k1, (H, n_site), jnp.float32,
                            -kaiming_bound, kaiming_bound)
    b1_bound = 1.0 / math.sqrt(n_site)
    b1 = jax.random.uniform(k2, (H, 1), jnp.float32, -b1_bound, b1_bound)

    xavier_bound = math.sqrt(6.0 / (H + 1))
    w2 = jax.random.uniform(k3, (H, 1), jnp.float32,
                            -xavier_bound, xavier_bound)
    b2_bound = 1.0 / math.sqrt(H)
    b2 = jax.random.uniform(k4, (1, 1), jnp.float32, -b2_bound, b2_bound)

    return w1, b1, w2, b2


def _reference(x, w1, b1, w2, b2):
    with jax.default_matmul_precision("highest"):
        h = jnp.maximum(x @ w1.T + b1.T, 0.0)
        return jnp.maximum(h @ w2 + b2, 0.0)


if __name__ == "__main__":
    nSite = 32   # H = nSite per the module

    key = jax.random.PRNGKey(0)
    kx, kp, kx2 = jax.random.split(key, 3)
    w1, b1, w2, b2 = init_params(kp, nSite)

    # Small smoke test (single tile, batch smaller than a lane).
    batch = 8
    x = jax.random.normal(kx, (batch, nSite), dtype=jnp.float32)
    out = jax.block_until_ready(network_forward(x, w1, b1, w2, b2))
    ref = jax.block_until_ready(_reference(x, w1, b1, w2, b2))
    assert out.shape == (batch, 1)
    assert jnp.allclose(out, ref, atol=1e-4, rtol=1e-4)

    # Multi-tile + ragged-tail test (exercises >=2 grid steps and the clamped
    # boundary block).
    batch2 = 200
    x2 = jax.random.normal(kx2, (batch2, nSite), dtype=jnp.float32)
    out2 = jax.block_until_ready(network_forward(x2, w1, b1, w2, b2, tile_b=128))
    ref2 = jax.block_until_ready(_reference(x2, w1, b1, w2, b2))
    assert out2.shape == (batch2, 1)
    assert jnp.allclose(out2, ref2, atol=1e-4, rtol=1e-4)

    print("KERNEL_OK")
</pallas_src>

<mosaic_0001>
module attributes {stable_mosaic.version = 11 : i64} {
  func.func @_mlp_kernel(%arg0: i32, %arg1: memref<128x32xf32, #tpu.memory_space<vmem>>, %arg2: memref<32x32xf32, #tpu.memory_space<vmem>>, %arg3: memref<32x1xf32, #tpu.memory_space<vmem>>, %arg4: memref<32x1xf32, #tpu.memory_space<vmem>>, %arg5: memref<1x1xf32, #tpu.memory_space<smem>>, %arg6: memref<1x128xf32, #tpu.memory_space<vmem>>) attributes {dimension_semantics = [#tpu.dimension_semantics<parallel>], iteration_bounds = array<i64: 1>, scalar_prefetch = 0 : i64, scratch_operands = 0 : i64, tpu.core_type = #tpu.core_type<tc>, window_params = [{transform_indices = @transform_0, window_bounds = array<i64: 128, 32>}, {pipeline_mode = #tpu.pipeline_mode<synchronous>, transform_indices = @transform_1, window_bounds = array<i64: 32, 32>}, {pipeline_mode = #tpu.pipeline_mode<synchronous>, transform_indices = @transform_2, window_bounds = array<i64: 32, 1>}, {pipeline_mode = #tpu.pipeline_mode<synchronous>, transform_indices = @transform_3, window_bounds = array<i64: 32, 1>}, {transform_indices = @transform_4, window_bounds = array<i64: 1, 1>}, {transform_indices = @transform_5, window_bounds = array<i64: 1, 128>}]} {
    %c0 = arith.constant 0 : index
    %c0_0 = arith.constant 0 : index
    %0 = vector.load %arg2[%c0, %c0_0] : memref<32x32xf32, #tpu.memory_space<vmem>>, vector<32x32xf32>
    %c0_1 = arith.constant 0 : index
    %c0_2 = arith.constant 0 : index
    %1 = vector.load %arg1[%c0_1, %c0_2] : memref<128x32xf32, #tpu.memory_space<vmem>>, vector<128x32xf32>
    %cst = arith.constant dense<0.000000e+00> : vector<32x128xf32>
    %2 = tpu.matmul %0, %1, %cst {dimension_numbers = #tpu.dot_dimension_numbers<[1], [1], [0], [0], [0, 0, 1, 0], [], []>, precision = #tpu.contract_precision<fp32>} : vector<32x32xf32>, vector<128x32xf32>, vector<32x128xf32> -> vector<32x128xf32>
    %c0_3 = arith.constant 0 : index
    %c0_4 = arith.constant 0 : index
    %3 = vector.load %arg3[%c0_3, %c0_4] : memref<32x1xf32, #tpu.memory_space<vmem>>, vector<32x1xf32>
    %4 = vector.broadcast %3 : vector<32x1xf32> to vector<32x128xf32>
    %5 = arith.addf %2, %4 : vector<32x128xf32>
    %cst_5 = arith.constant 0.000000e+00 : f32
    %6 = vector.broadcast %cst_5 : f32 to vector<32x128xf32>
    %7 = arith.maximumf %5, %6 : vector<32x128xf32>
    %c0_6 = arith.constant 0 : index
    %c0_7 = arith.constant 0 : index
    %8 = vector.load %arg4[%c0_6, %c0_7] : memref<32x1xf32, #tpu.memory_space<vmem>>, vector<32x1xf32>
    %9 = vector.broadcast %8 : vector<32x1xf32> to vector<32x128xf32>
    %10 = arith.mulf %7, %9 : vector<32x128xf32>
    %cst_8 = arith.constant dense<0.000000e+00> : vector<128xf32>
    %11 = vector.multi_reduction <add>, %10, %cst_8 [0] : vector<32x128xf32> to vector<128xf32>
    %12 = vector.shape_cast %11 : vector<128xf32> to vector<1x128xf32>
    %c0_9 = arith.constant 0 : index
    %c0_10 = arith.constant 0 : index
    %13 = memref.load %arg5[%c0_9, %c0_10] : memref<1x1xf32, #tpu.memory_space<smem>>
    %14 = vector.broadcast %13 : f32 to vector<1x128xf32>
    %15 = arith.addf %12, %14 : vector<1x128xf32>
    %cst_11 = arith.constant 0.000000e+00 : f32
    %16 = vector.broadcast %cst_11 : f32 to vector<1x128xf32>
    %17 = arith.maximumf %15, %16 : vector<1x128xf32>
    %c0_12 = arith.constant 0 : index
    %c0_13 = arith.constant 0 : index
    %18 = vector.load %arg6[%c0_12, %c0_13] : memref<1x128xf32, #tpu.memory_space<vmem>>, vector<1x128xf32>
    tpu.vector_store %arg6[%c0_12, %c0_13], %17 {strides = array<i32>} : memref<1x128xf32, #tpu.memory_space<vmem>>, vector<1x128xf32>,
    return
  }
  func.func @transform_0(%arg0: i32) -> (i32, i32) {
    %c0_i32 = arith.constant 0 : i32
    %c0_i32_0 = arith.constant 0 : i32
    return %arg0, %c0_i32 : i32, i32
  }
  func.func @transform_1(%arg0: i32) -> (i32, i32) {
    %c0_i32 = arith.constant 0 : i32
    %c0_i32_0 = arith.constant 0 : i32
    %c0_i32_1 = arith.constant 0 : i32
    return %c0_i32, %c0_i32_0 : i32, i32
  }
  func.func @transform_2(%arg0: i32) -> (i32, i32) {
    %c0_i32 = arith.constant 0 : i32
    %c0_i32_0 = arith.constant 0 : i32
    %c0_i32_1 = arith.constant 0 : i32
    return %c0_i32, %c0_i32_0 : i32, i32
  }
  func.func @transform_3(%arg0: i32) -> (i32, i32) {
    %c0_i32 = arith.constant 0 : i32
    %c0_i32_0 = arith.constant 0 : i32
    %c0_i32_1 = arith.constant 0 : i32
    return %c0_i32, %c0_i32_0 : i32, i32
  }
  func.func @transform_4(%arg0: i32) -> (i32, i32) {
    %c0_i32 = arith.constant 0 : i32
    %c0_i32_0 = arith.constant 0 : i32
    %c0_i32_1 = arith.constant 0 : i32
    return %c0_i32, %c0_i32_0 : i32, i32
  }
  func.func @transform_5(%arg0: i32) -> (i32, i32) {
    %c0_i32 = arith.constant 0 : i32
    %c0_i32_0 = arith.constant 0 : i32
    return %c0_i32, %arg0 : i32, i32
  }
}

</mosaic_0001>

<bundles_post_ra>
// kernel: tpu_custom_call.1
= control target key start
LH: loop header
LB: loop body
LE: loop exit
PB: predicated region body
PF: predicated region fallthrough
CT: control target
= control target key end

     0   :  { %vm66_vm0 = vcmask 261120   ;;  %s1936_s0 = inlined_call_operand.vmem [shape: f32[8,32], index: 0, kind: input, shape index: {}]   ;;  %s1937_s1 = inlined_call_operand.vmem [shape: f32[32,32], index: 1, kind: input, shape index: {}]   ;;  %s1938_s2 = inlined_call_operand.vmem [shape: f32[32,1], index: 2, kind: input, shape index: {}]   ;;  %s1939_s3 = inlined_call_operand.vmem [shape: f32[32,1], index: 3, kind: input, shape index: {}]   ;;  %s1940_s4 = inlined_call_operand.<no memory space> [shape: f32[1,1], index: 4, kind: input, shape index: {}]   ;;  %s1941_s5 = inlined_call_operand.hbm [shape: f32[1,128], index: 5, kind: output, shape index: {}]  }
   0x1   :  { %v26_v0 = vld [vmem:[%s1936_s0] sm:$0xff]  ;;  %v27_v1 = vld [vmem:[%s1936_s0 + $0x8] sm:$0xff]  ;;  %v28_v2 = vld [vmem:[%s1936_s0 + $0x10] sm:$0xff] }
   0x2   :  { %v1591_v3 = vsel %vm66_vm0, %v26_v0, 0  ;;  %v1594_v4 = vsel %vm66_vm0, %v27_v1, 0  ;;  %v29_v5 = vld [vmem:[%s1936_s0 + $0x18] sm:$0xff]  ;;  %v1600_v6 = vsel %vm66_vm0, %v28_v2, 0  ;;  %v30_v11 = vld [vmem:[%s1936_s0 + $0x20] sm:$0xff]  ;;  %v31_v12 = vld [vmem:[%s1936_s0 + $0x28] sm:$0xff] }
   0x3   :  { %v128_v7 = vand.u32 4294901760, %v1591_v3  ;;  %v131_v8 = vand.u32 4294901760, %v1594_v4  ;;  %v1605_v9 = vsel %vm66_vm0, %v29_v5, 0  ;;  %v134_v10 = vand.u32 4294901760, %v1600_v6  ;;  %v22_v18 = vld [vmem:[%s1937_s1] sm:$0xff] }
   0x4   :  { %v137_v13 = vand.u32 4294901760, %v1605_v9  ;;  %v92_v16 = vsel %vm66_vm0, %v30_v11, 0  ;;  %v95_v17 = vsel %vm66_vm0, %v31_v12, 0 }
   0x5   :  { %v1615_v14 = vpack.c.bf16 %v131_v8, %v128_v7 }
   0x6   :  { %v1617_v15 = vpack.c.bf16 %v137_v13, %v134_v10 }
   0x7   :  { %1306 = vmatprep.subr.bf16.mxu1 %v1615_v14  ;;  %1402 = vmatprep.subr.bf16.mxu0 %v1615_v14 }
   0x8   :  { %1308 = vmatpush3.bf16.xpose.msra.mxu1 %v1615_v14  ;;  %1404 = vmatpush3.bf16.xpose.msra.mxu0 %v1615_v14 }
   0x9   :  { %11 = vsyncpa [#allocation4], 0  ;;  %1310 = vmatprep.subr.bf16.mxu1 %v1617_v15  ;;  %1406 = vmatprep.subr.bf16.mxu0 %v1617_v15  ;;  %v140_v19 = vand.u32 4294901760, %v92_v16  ;;  %v143_v20 = vand.u32 4294901760, %v95_v17  ;;  %v32_v21 = vld [vmem:[%s1936_s0 + $0x30] sm:$0xff]  ;;  %v33_v22 = vld [vmem:[%s1936_s0 + $0x38] sm:$0xff]  ;;  %v1681_v48 = vsub.f32 %v1591_v3, %v128_v7  ;;  %v1684_v49 = vsub.f32 %v1594_v4, %v131_v8 }
   0xa   :  { %v68_v23 = vsel %vm66_vm0, %v22_v18, 0  ;;  %v98_v26 = vsel %vm66_vm0, %v32_v21, 0  ;;  %v101_v27 = vsel %vm66_vm0, %v33_v22, 0  ;;  %v34_v33 = vld [vmem:[%s1936_s0 + $0x40] sm:$0xff]  ;;  %v35_v34 = vld [vmem:[%s1936_s0 + $0x48] sm:$0xff]  ;;  %v36_v41 = vld [vmem:[%s1936_s0 + $0x50] sm:$0xff]  ;;  %v1690_v51 = vsub.f32 %v1600_v6, %v134_v10 }
   0xb   :  { %v1637_v24 = vand.u32 4294901760, %v68_v23  ;;  %v1639_v25 = vpack.c.bf16 %v143_v20, %v140_v19  ;;  %v146_v30 = vand.u32 4294901760, %v98_v26  ;;  %v149_v31 = vand.u32 4294901760, %v101_v27  ;;  %v37_v42 = vld [vmem:[%s1936_s0 + $0x58] sm:$0xff]  ;;  %v38_v50 = vld [vmem:[%s1936_s0 + $0x60] sm:$0xff]  ;;  %v39_v55 = vld [vmem:[%s1936_s0 + $0x68] sm:$0xff] }
   0xc   :  { %v104_v37 = vsel %vm66_vm0, %v34_v33, 0  ;;  %v107_v38 = vsel %vm66_vm0, %v35_v34, 0  ;;  %v110_v44 = vsel %vm66_vm0, %v36_v41, 0  ;;  %v113_v45 = vsel %vm66_vm0, %v37_v42, 0  ;;  %v41_v10 = vld [vmem:[%s1936_s0 + $0x78] sm:$0xff]  ;;  %v23_v12 = vld [vmem:[%s1937_s1 + $0x8] sm:$0xff] }
   0xd   :  { %v1644_v28 = vsub.f32 %v68_v23, %v1637_v24  ;;  %v1658_v36 = vpack.c.bf16 %v149_v31, %v146_v30  ;;  %v152_v39 = vand.u32 4294901760, %v104_v37  ;;  %v155_v40 = vand.u32 4294901760, %v107_v38  ;;  %s1550_s22 = smov [#allocation3]  }
   0xe   :  { %v158_v46 = vand.u32 4294901760, %v110_v44  ;;  %v161_v47 = vand.u32 4294901760, %v113_v45  ;;  %v1693_v52 = vsub.f32 %v1605_v9, %v137_v13  ;;  %v1695_v53 = vsub.f32 %v92_v16, %v140_v19  ;;  %v40_v9 = vld [vmem:[%s1936_s0 + $0x70] sm:$0xff]  ;;  %s949_s23 = sshll.u32 %s1550_s22, 4  ;;  %s950_s23 = int_to_ptr.vmem [resolvable:$true] %s949_s23 }
   0xf   :  { %v210_v29 = vand.u32 4294901760, %v1644_v28  ;;  %v1672_v43 = vpack.c.bf16 %v155_v40, %v152_v39  ;;  %v1697_v54 = vsub.f32 %v95_v17, %v143_v20  ;;  %v1702_v56 = vsub.f32 %v98_v26, %v146_v30  ;;  %v24_v20 = vld [vmem:[%s1937_s1 + $0x10] sm:$0xff]  ;;  %s1525_s24 = scalar_lea.vmem %s950_s23, 16  ;;  %s1529_s25 = scalar_lea.vmem %s950_s23, 32 }
  0x10   :  { %1312 = vmatpush3.bf16.xpose.msra.mxu1 %v1617_v15  ;;  %1408 = vmatpush3.bf16.xpose.msra.mxu0 %v1617_v15  ;;  %v1704_v57 = vsub.f32 %v101_v27, %v149_v31  ;;  %v1708_v58 = vpack.c.bf16 %v1684_v49, %v1681_v48  ;;  %v1710_v59 = vsub.f32 %v104_v37, %v152_v39  ;;  %v116_v0 = vsel %vm66_vm0, %v38_v50, 0  ;;  %p1526_p0 = scmp.ne.s32.totalorder %s950_s23, %s1525_s24  ;;  %p1530_p1 = scmp.lt.s32.totalorder %s950_s23, %s950_s23 }
  0x11   :  { %1314 = vmatprep.subr.bf16.mxu1 %v1639_v25  ;;  %1410 = vmatprep.subr.bf16.mxu0 %v1639_v25  ;;  %v211_v32 = vsub.f32 %v1644_v28, %v210_v29  ;;  %v1712_v60 = vsub.f32 %v107_v38, %v155_v40  ;;  %v1716_v61 = vpack.c.bf16 %v1693_v52, %v1690_v51  ;;  %v119_v2 = vsel %vm66_vm0, %v39_v55, 0  ;;  %p1531_p2 = scmp.lt.s32.totalorder %s1529_s25, %s1525_s24 }
  0x12   :  { %1223 = vmatprep.mubr.f32.mxu0 %v210_v29  ;;  %v1720_v62 = vpack.c.bf16 %v1697_v54, %v1695_v53  ;;  %v1722_v63 = vpack.c.bf16 %v161_v47, %v158_v46  ;;  %v1727_v1 = vpack.c.bf16 %v1704_v57, %v1702_v56  ;;  %v1730_v3 = vsub.f32 %v110_v44, %v158_v46  ;;  %v25_v29 = vld [vmem:[%s1937_s1 + $0x18] sm:$0xff] }
  0x13   :  { %v212_v35 = vand.u32 4294901760, %v211_v32  ;;  %v1732_v4 = vsub.f32 %v113_v45, %v161_v47  ;;  %v1736_v5 = vpack.c.bf16 %v1712_v60, %v1710_v59  ;;  %v164_v7 = vand.u32 4294901760, %v116_v0  ;;  %p1532_p3 = por %p1531_p2, %p1530_p1 }
  0x14   :  { %v167_v8 = vand.u32 4294901760, %v119_v2  ;;  %v122_v13 = vsel %vm66_vm0, %v40_v9, 0  ;;  %v125_v16 = vsel %vm66_vm0, %v41_v10, 0  ;;  %v71_v19 = vsel %vm66_vm0, %v23_v12, 0 }
  0x15   :  { %1109 = vmatprep.mubr.f32.mxu1 %v212_v35  ;;  %v1742_v6 = vpack.c.bf16 %v1732_v4, %v1730_v3  ;;  %v1759_v17 = vsub.f32 %v116_v0, %v164_v7  ;;  %v170_v22 = vand.u32 4294901760, %v122_v13  ;;  %v173_v23 = vand.u32 4294901760, %v125_v16  ;;  %p1533_p4 = pnand %p1532_p3, %p1526_p0 }
  0x16   :  { %v1752_v11 = vpack.c.bf16 %v167_v8, %v164_v7  ;;  %v1761_v18 = vsub.f32 %v119_v2, %v167_v8  ;;  %v251_v26 = vand.u32 4294901760, %v1681_v48  ;;  %v258_v27 = vand.u32 4294901760, %v1684_v49 }
  0x17   :  { %v1780_v30 = vand.u32 4294901760, %v71_v19  ;;  %v74_v31 = vsel %vm66_vm0, %v24_v20, 0  ;;  %v77_v32 = vsel %vm66_vm0, %v25_v29, 0  ;;  %v1784_v33 = vpack.c.bf16 %v173_v23, %v170_v22 }
  0x18   :  { %1316 = vmatpush3.bf16.xpose.msra.mxu1 %v1639_v25  ;;  %1412 = vmatpush3.bf16.xpose.msra.mxu0 %v1639_v25  ;;  %v1771_v21 = vpack.c.bf16 %v1761_v18, %v1759_v17  ;;  %v252_v34 = vsub.f32 %v1681_v48, %v251_v26  ;;  %v259_v35 = vsub.f32 %v1684_v49, %v258_v27  ;;  %v1792_v39 = vand.u32 4294901760, %v74_v31 }
  0x19   :  { %1318 = vmatprep.subr.bf16.mxu1 %v1658_v36  ;;  %1414 = vmatprep.subr.bf16.mxu0 %v1658_v36  ;;  %v1788_v37 = vsub.f32 %v122_v13, %v170_v22  ;;  %v1790_v38 = vsub.f32 %v125_v16, %v173_v23  ;;  %v1795_v40 = vsub.f32 %v71_v19, %v1780_v30  ;;  %v1797_v41 = vand.u32 4294901760, %v77_v32 }
  0x1a   :  { %v253_v44 = vand.u32 4294901760, %v252_v34  ;;  %v260_v45 = vand.u32 4294901760, %v259_v35  ;;  %v265_v46 = vand.u32 4294901760, %v1690_v51  ;;  %v272_v47 = vand.u32 4294901760, %v1693_v52 }
  0x1b   :  { %v1803_v42 = vpack.c.bf16 %v1790_v38, %v1788_v37  ;;  %v1810_v48 = vsub.f32 %v74_v31, %v1792_v39  ;;  %v220_v49 = vand.u32 4294901760, %v1795_v40  ;;  %v1814_v50 = vsub.f32 %v77_v32, %v1797_v41 }
  0x1c   :  { %v1337_v55 = vpack.c.bf16 %v260_v45, %v253_v44  ;;  %v1433_v0 = vpack.c.bf16 %v258_v27, %v251_v26  ;;  %v266_v2 = vsub.f32 %v1690_v51, %v265_v46  ;;  %v273_v7 = vsub.f32 %v1693_v52, %v272_v47 }
  0x1d   :  { %v230_v8 = vand.u32 4294901760, %v1810_v48  ;;  %v221_v9 = vsub.f32 %v1795_v40, %v220_v49  ;;  %v240_v10 = vand.u32 4294901760, %v1814_v50  ;;  %v279_v16 = vand.u32 4294901760, %v1695_v53 }
  0x1e   :  { %v267_v12 = vand.u32 4294901760, %v266_v2  ;;  %v274_v13 = vand.u32 4294901760, %v273_v7  ;;  %v286_v51 = vand.u32 4294901760, %v1697_v54  ;;  %v1437_v23 = vpack.c.bf16 %v272_v47, %v265_v46  ;;  %v45_v2 = vld [vmem:[%s1938_s2 + $0x18] sm:$0xff] }
  0x1f   :  { %v231_v52 = vsub.f32 %v1810_v48, %v230_v8  ;;  %v222_v19 = vand.u32 4294901760, %v221_v9  ;;  %v241_v20 = vsub.f32 %v1814_v50, %v240_v10  ;;  %v280_v26 = vsub.f32 %v1695_v53, %v279_v16  ;;  %v42_v53 = vld [vmem:[%s1938_s2] sm:$0xff] }
  0x20   :  { %1320 = vmatpush3.bf16.xpose.msra.mxu1 %v1658_v36  ;;  %1416 = vmatpush3.bf16.xpose.msra.mxu0 %v1658_v36  ;;  %v1341_v22 = vpack.c.bf16 %v274_v13, %v267_v12  ;;  %v287_v27 = vsub.f32 %v1697_v54, %v286_v51  ;;  %v293_v35 = vand.u32 4294901760, %v1702_v56  ;;  %v300_v44 = vand.u32 4294901760, %v1704_v57  ;;  %v44_v54 = vld [vmem:[%s1938_s2 + $0x10] sm:$0xff]  ;;  %v901_v9 = vld [vmem:[%s1939_s3] sm:$0xff] }
  0x21   :  { %1322 = vmatprep.subr.bf16.mxu1 %v1672_v43  ;;  %1418 = vmatprep.subr.bf16.mxu0 %v1672_v43  ;;  %v232_v29 = vand.u32 4294901760, %v231_v52  ;;  %v242_v31 = vand.u32 4294901760, %v241_v20  ;;  %v281_v32 = vand.u32 4294901760, %v280_v26  ;;  %v1441_v45 = vpack.c.bf16 %v286_v51, %v279_v16  ;;  %v903_v52 = vld [vmem:[%s1939_s3 + $0x10] sm:$0xff] }
  0x22   :  { %v288_v34 = vand.u32 4294901760, %v287_v27  ;;  %v294_v47 = vsub.f32 %v1702_v56, %v293_v35  ;;  %v1445_v13 = vpack.c.bf16 %v300_v44, %v293_v35  ;;  %v342_v35 = vand.u32 4294901760, %v1761_v18 }
  0x24   :  { %v1345_v46 = vpack.c.bf16 %v288_v34, %v281_v32  ;;  %v295_v56 = vand.u32 4294901760, %v294_v47  ;;  %v335_v34 = vand.u32 4294901760, %v1759_v17  ;;  %v356_v47 = vand.u32 4294901760, %v1790_v38 }
  0x28   :  { %1324 = vmatpush3.bf16.xpose.msra.mxu1 %v1672_v43  ;;  %1420 = vmatpush3.bf16.xpose.msra.mxu0 %v1672_v43 }
  0x29   :  { %1326 = vmatprep.subr.bf16.mxu1 %v1722_v63  ;;  %1422 = vmatprep.subr.bf16.mxu0 %v1722_v63 }
  0x30   :  { %1328 = vmatpush3.bf16.xpose.msra.mxu1 %v1722_v63  ;;  %1424 = vmatpush3.bf16.xpose.msra.mxu0 %v1722_v63 }
  0x31   :  { %1330 = vmatprep.subr.bf16.mxu1 %v1752_v11  ;;  %1426 = vmatprep.subr.bf16.mxu0 %v1752_v11 }
  0x38   :  { %1332 = vmatpush3.bf16.xpose.msra.mxu1 %v1752_v11  ;;  %1428 = vmatpush3.bf16.xpose.msra.mxu0 %v1752_v11 }
  0x39   :  { %1334 = vmatprep.subr.bf16.mxu1 %v1784_v33  ;;  %1430 = vmatprep.subr.bf16.mxu0 %v1784_v33 }
  0x40   :  { %1336 = vmatpush3.bf16.xpose.msra.mxu1 %v1784_v33  ;;  %1432 = vmatpush3.bf16.xpose.msra.mxu0 %v1784_v33 }
  0x41   :  { %1338 = vmatprep.subr.bf16.mxu1 %v1337_v55  ;;  %1434 = vmatprep.subr.bf16.mxu0 %v1433_v0 }
  0x47   :  { %1110 = vmatmul.mubr.f32.vlgmr.msra.gmra.mrb[0].mxu1 %v222_v19  ;;  %1224 = vmatmul.mubr.f32.vlgmr.msra.gmra.mrb[0].mxu0 %v220_v49  ;;  %v301_v49 = vsub.f32 %v1704_v57, %v300_v44  ;;  %v307_v57 = vand.u32 4294901760, %v1710_v59  ;;  %v904_v19 = vld [vmem:[%s1939_s3 + $0x18] sm:$0xff] }
  0x48   :  { %1340 = vmatpush3.bf16.xpose.msra.mxu1 %v1337_v55  ;;  %1436 = vmatpush3.bf16.xpose.msra.mxu0 %v1433_v0  ;;  %v1549_v55 = vmov 0   ;;  %v43_v0 = vld [vmem:[%s1938_s2 + $0x8] sm:$0xff] }
  0x49   :  { %1342 = vmatprep.subr.bf16.mxu1 %v1341_v22  ;;  %1438 = vmatprep.subr.bf16.mxu0 %v1437_v23  ;;  %v302_v7 = vand.u32 4294901760, %v301_v49  ;;  %v308_v16 = vsub.f32 %v1710_v59, %v307_v57  ;;  %v321_v59 = vand.u32 4294901760, %v1730_v3 }
  0x4a   :  { %1112 = vmatprep.mubr.f32.mxu1 %v232_v29  ;;  %1226 = vmatprep.mubr.f32.mxu0 %v230_v8  ;;  %v314_v8 = vand.u32 4294901760, %v1712_v60 }
  0x4b   :  { %1113 = vmatmul.mubr.f32.gmra.mrb[2].mxu1 %v242_v31  ;;  %1227 = vmatmul.mubr.f32.gmra.mrb[2].mxu0 %v240_v10  ;;  %v902_v10 = vld [vmem:[%s1939_s3 + $0x8] sm:$0xff]  ;;  %v1349_v12 = vpack.c.bf16 %v302_v7, %v295_v56  ;;  %v309_v20 = vand.u32 4294901760, %v308_v16  ;;  %v322_v27 = vsub.f32 %v1730_v3, %v321_v59 }
  0x4c   :  { %1147 = vmatprep.mubr.f32.mxu1 %v1637_v24  ;;  %1261 = vmatprep.mubr.f32.mxu0 %v1637_v24  ;;  %v315_v51 = vsub.f32 %v1712_v60, %v314_v8  ;;  %v328_v60 = vand.u32 4294901760, %v1732_v4  ;;  %v1449_v26 = vpack.c.bf16 %v314_v8, %v307_v57 }
  0x4d   :  { %1523 = vset.pattern.permute.xlu0 %v1549_v55  ;;  %1524 = vset.pattern.permute.xlu1 %v1549_v55  ;;  %v323_v31 = vand.u32 4294901760, %v322_v27  ;;  %v1457_v55 = vpack.c.bf16 %v342_v35, %v335_v34 }
  0x4e   :  { %48 = vperm.xlu0 %1523, %v42_v53   ;;  %58 = vperm.xlu1 %1524, %v44_v54   ;;  %v329_v29 = vsub.f32 %v1732_v4, %v328_v60  ;;  %v1453_v53 = vpack.c.bf16 %v328_v60, %v321_v59  ;;  %v336_v54 = vsub.f32 %v1759_v17, %v335_v34 }
  0x50   :  { %1344 = vmatpush3.bf16.xpose.msra.mxu1 %v1341_v22  ;;  %1440 = vmatpush3.bf16.xpose.msra.mxu0 %v1437_v23  ;;  %v316_v22 = vand.u32 4294901760, %v315_v51  ;;  %v330_v32 = vand.u32 4294901760, %v329_v29  ;;  %v337_v3 = vand.u32 4294901760, %v336_v54 }
  0x51   :  { %1346 = vmatprep.subr.bf16.mxu1 %v1345_v46  ;;  %1442 = vmatprep.subr.bf16.mxu0 %v1441_v45 }
  0x52   :  { %53 = vperm.xlu0 %1523, %v43_v0   ;;  %63 = vperm.xlu1 %1524, %v45_v2   ;;  %v1353_v23 = vpack.c.bf16 %v316_v22, %v309_v20  ;;  %v1357_v44 = vpack.c.bf16 %v330_v32, %v323_v31  ;;  %v357_v2 = vsub.f32 %v1790_v38, %v356_v47 }
  0x56   :  { %907 = vperm.xlu0 %1523, %v901_v9   ;;  %912 = vperm.xlu1 %1524, %v902_v10  }
  0x58   :  { %1348 = vmatpush3.bf16.xpose.msra.mxu1 %v1345_v46  ;;  %1444 = vmatpush3.bf16.xpose.msra.mxu0 %v1441_v45  ;;  %v343_v45 = vsub.f32 %v1761_v18, %v342_v35  ;;  %v349_v46 = vand.u32 4294901760, %v1788_v37  ;;  %v358_v18 = vand.u32 4294901760, %v357_v2 }
  0x59   :  { %1350 = vmatprep.subr.bf16.mxu1 %v1349_v12  ;;  %1446 = vmatprep.subr.bf16.mxu0 %v1445_v13 }
  0x5a   :  { %917 = vperm.xlu0 %1523, %v903_v52   ;;  %922 = vperm.xlu1 %1524, %v904_v19   ;;  %v344_v4 = vand.u32 4294901760, %v343_v45  ;;  %v350_v0 = vsub.f32 %v1788_v37, %v349_v46  ;;  %v1461_v7 = vpack.c.bf16 %v356_v47, %v349_v46 }
  0x5c   :  { %v1361_v49 = vpack.c.bf16 %v344_v4, %v337_v3  ;;  %v351_v17 = vand.u32 4294901760, %v350_v0 }
  0x5e   :  { %v1365_v56 = vpack.c.bf16 %v358_v18, %v351_v17 }
  0x60   :  { %1352 = vmatpush3.bf16.xpose.msra.mxu1 %v1349_v12  ;;  %1448 = vmatpush3.bf16.xpose.msra.mxu0 %v1445_v13 }
  0x61   :  { %1354 = vmatprep.subr.bf16.mxu1 %v1353_v23  ;;  %1450 = vmatprep.subr.bf16.mxu0 %v1449_v26 }
  0x68   :  { %1356 = vmatpush3.bf16.xpose.msra.mxu1 %v1353_v23  ;;  %1452 = vmatpush3.bf16.xpose.msra.mxu0 %v1449_v26  ;;  %v939_v23 = vstv %s1940_s4 }
  0x69   :  { %1358 = vmatprep.subr.bf16.mxu1 %v1357_v44  ;;  %1454 = vmatprep.subr.bf16.mxu0 %v1453_v53 }
  0x70   :  { %1360 = vmatpush3.bf16.xpose.msra.mxu1 %v1357_v44  ;;  %1456 = vmatpush3.bf16.xpose.msra.mxu0 %v1453_v53 }
  0x71   :  { %1362 = vmatprep.subr.bf16.mxu1 %v1361_v49  ;;  %1458 = vmatprep.subr.bf16.mxu0 %v1457_v55 }
  0x78   :  { %1364 = vmatpush3.bf16.xpose.msra.mxu1 %v1361_v49  ;;  %1460 = vmatpush3.bf16.xpose.msra.mxu0 %v1457_v55 }
  0x79   :  { %1366 = vmatprep.subr.bf16.mxu1 %v1365_v56  ;;  %1462 = vmatprep.subr.bf16.mxu0 %v1461_v7 }
  0x80   :  { %1368 = vmatpush3.bf16.xpose.msra.mxu1 %v1365_v56  ;;  %1464 = vmatpush3.bf16.xpose.msra.mxu0 %v1461_v7 }
  0x81   :  { %1370 = vmatprep.subr.bf16.mxu1 %v1708_v58  ;;  %1466 = vmatprep.subr.bf16.mxu0 %v1615_v14 }
  0x87   :  { %1148 = vmatmul.mubr.f32.vlgmr.msra.gmra.mrb[0].mxu1 %v1780_v30  ;;  %1262 = vmatmul.mubr.f32.vlgmr.msra.gmra.mrb[0].mxu0 %v1780_v30 }
  0x88   :  { %1372 = vmatpush3.bf16.xpose.msra.mxu1 %v1708_v58  ;;  %1468 = vmatpush3.bf16.xpose.msra.mxu0 %v1615_v14 }
  0x89   :  { %1374 = vmatprep.subr.bf16.mxu1 %v1716_v61  ;;  %1470 = vmatprep.subr.bf16.mxu0 %v1617_v15 }
  0x8a   :  { %1150 = vmatprep.mubr.f32.mxu1 %v1792_v39  ;;  %1264 = vmatprep.mubr.f32.mxu0 %v1792_v39 }
  0x8b   :  { %1151 = vmatmul.mubr.f32.gmra.mrb[2].mxu1 %v1797_v41  ;;  %1265 = vmatmul.mubr.f32.gmra.mrb[2].mxu0 %v1797_v41 }
  0x8c   :  { %1185 = vmatprep.mubr.f32.mxu1 %v1644_v28  ;;  %1299 = vmatprep.mubr.f32.mxu0 %v1637_v24 }
  0x90   :  { %1376 = vmatpush3.bf16.xpose.msra.mxu1 %v1716_v61  ;;  %1472 = vmatpush3.bf16.xpose.msra.mxu0 %v1617_v15 }
  0x91   :  { %1378 = vmatprep.subr.bf16.mxu1 %v1720_v62  ;;  %1474 = vmatprep.subr.bf16.mxu0 %v1639_v25 }
  0x98   :  { %1380 = vmatpush3.bf16.xpose.msra.mxu1 %v1720_v62  ;;  %1476 = vmatpush3.bf16.xpose.msra.mxu0 %v1639_v25 }
  0x99   :  { %1382 = vmatprep.subr.bf16.mxu1 %v1727_v1  ;;  %1478 = vmatprep.subr.bf16.mxu0 %v1658_v36 }
  0xa0   :  { %1384 = vmatpush3.bf16.xpose.msra.mxu1 %v1727_v1  ;;  %1480 = vmatpush3.bf16.xpose.msra.mxu0 %v1658_v36 }
  0xa1   :  { %1386 = vmatprep.subr.bf16.mxu1 %v1736_v5  ;;  %1482 = vmatprep.subr.bf16.mxu0 %v1672_v43 }
  0xa8   :  { %1388 = vmatpush3.bf16.xpose.msra.mxu1 %v1736_v5  ;;  %1484 = vmatpush3.bf16.xpose.msra.mxu0 %v1672_v43 }
  0xa9   :  { %1390 = vmatprep.subr.bf16.mxu1 %v1742_v6  ;;  %1486 = vmatprep.subr.bf16.mxu0 %v1722_v63 }
  0xb0   :  { %1392 = vmatpush3.bf16.xpose.msra.mxu1 %v1742_v6  ;;  %1488 = vmatpush3.bf16.xpose.msra.mxu0 %v1722_v63 }
  0xb1   :  { %1394 = vmatprep.subr.bf16.mxu1 %v1771_v21  ;;  %1490 = vmatprep.subr.bf16.mxu0 %v1752_v11 }
  0xb8   :  { %1396 = vmatpush3.bf16.xpose.msra.mxu1 %v1771_v21  ;;  %1492 = vmatpush3.bf16.xpose.msra.mxu0 %v1752_v11 }
  0xb9   :  { %1398 = vmatprep.subr.bf16.mxu1 %v1803_v42  ;;  %1494 = vmatprep.subr.bf16.mxu0 %v1784_v33 }
  0xc0   :  { %1400 = vmatpush3.bf16.xpose.msra.mxu1 %v1803_v42  ;;  %1496 = vmatpush3.bf16.xpose.msra.mxu0 %v1784_v33 }
  0xc7   :  { %1186 = vmatmul.mubr.f32.vlgmr.msra.gmra.mrb[0].mxu1 %v1795_v40  ;;  %1300 = vmatmul.mubr.f32.vlgmr.msra.gmra.mrb[0].mxu0 %v1780_v30 }
  0xc8   :  { %1188 = vmatprep.mubr.f32.mxu1 %v1810_v48  ;;  %1302 = vmatprep.mubr.f32.mxu0 %v1792_v39 }
  0xcb   :  { %1189 = vmatmul.mubr.f32.gmra.mrb[2].mxu1 %v1814_v50  ;;  %1303 = vmatmul.mubr.f32.gmra.mrb[2].mxu0 %v1797_v41 }
  0xcd   :  { %v49_v14 = vpop.permute.xlu0 %48  ;;  %v59_v15 = vpop.permute.xlu1 %58 }
  0xd1   :  { %v54_v24 = vpop.permute.xlu0 %53  ;;  %v64_v25 = vpop.permute.xlu1 %63 }
  0xd5   :  { %v908_v63 = vpop.permute.xlu0 %907  ;;  %v913_v38 = vpop.permute.xlu1 %912 }
  0xd9   :  { %v918_v10 = vpop.permute.xlu0 %917  ;;  %v923_v13 = vpop.permute.xlu1 %922 }
 0x19a   :  { %v1187_v28 = vpop.f32.mrb[0].mxu1  ;;  %v1301_v36 = vpop.f32.mrb[0].mxu0 }
 0x19b   :  { %v1497_v43 = vadd.f32 %v1187_v28, %v54_v24  ;;  %v517_v58 = vpop.f32.mrb[1].mxu1  ;;  %v875_v61 = vpop.f32.mrb[1].mxu0 }
 0x19c   :  { %v1499_v62 = vadd.f32 %v517_v58, %v49_v14 }
 0x19d   :  { %v1498_v1 = vadd.f32 %v1497_v43, %v1301_v36 }
 0x19e   :  { %v1500_v5 = vadd.f32 %v1499_v62, %v875_v61  ;;  %v1190_v6 = vpop.f32.mrb[2].mxu1  ;;  %v1304_v11 = vpop.f32.mrb[2].mxu0 }
 0x19f   :  { %v898_v21 = vmax.f32 %v1498_v1, 0.0  ;;  %v1501_v30 = vadd.f32 %v1190_v6, %v64_v25  ;;  %v531_v33 = vpop.f32.mrb[3].mxu1  ;;  %v887_v37 = vpop.f32.mrb[3].mxu0 }
 0x1a0   :  { %v897_v39 = vmax.f32 %v1500_v5, 0.0  ;;  %v1503_v40 = vadd.f32 %v531_v33, %v59_v15 }
 0x1a1   :  { %v926_v41 = vmul.f32 %v913_v38, %v898_v21  ;;  %v1502_v42 = vadd.f32 %v1501_v30, %v1304_v11 }
 0x1a2   :  { %v925_v48 = vmul.f32 %v908_v63, %v897_v39  ;;  %v1504_v50 = vadd.f32 %v1503_v40, %v887_v37 }
 0x1a3   :  { %v900_v8 = vmax.f32 %v1502_v42, 0.0 }
 0x1a4   :  { %v929_v57 = vadd.f32 %v926_v41, %v925_v48  ;;  %v899_v9 = vmax.f32 %v1504_v50, 0.0 }
 0x1a5   :  { %v928_v16 = vmul.f32 %v923_v13, %v900_v8 }
 0x1a6   :  { %v927_v12 = vmul.f32 %v918_v10, %v899_v9 }
 0x1a8   :  { %v930_v51 = vadd.f32 %v929_v57, %v927_v12 }
 0x1aa   :  { %v931_v52 = vadd.f32 %v930_v51, %v928_v16 }
 0x1ac   :  { %v932_v19 = vrot.slane %v931_v52, 4 }
 0x1ae   :  { %v933_v20 = vadd.f32 %v932_v19, %v931_v52 }
 0x1b0   :  { %v934_v22 = vrot.slane %v933_v20, 2 }
 0x1b2   :  { %v935_v59 = vadd.f32 %v934_v22, %v933_v20 }
 0x1b4   :  { %v936_v60 = vrot.slane %v935_v59, 1 }
 0x1b6   :  { %v937_v26 = vadd.f32 %v936_v60, %v935_v59 }
 0x1b8   :  { %v940_v27 = vadd.f32 %v939_v23, %v937_v26 }
 0x1ba   :  { %v941_v29 = vmax.f32 %v940_v27, 0.0 }
 0x1bc   :  { %942 = vst [vmem:[#allocation3] sm:$0x1] %v941_v29 }
 0x1bd   :  { %1536 = shalt.err (!%p1533_p4)
}
 0x1be   :  { %s1537_s28 = scalar_lea.hbm %s1941_s5, 16 }
 0x1bf   :  { %p1538_p5 = scmp.ne.s32.totalorder %s1941_s5, %s1537_s28  ;;  %p1541_p6 = scmp.lt.u32.totalorder %s1537_s28, %s1941_s5 }
 0x1c1   :  { %p1543_p7 = pnand %p1541_p6, %p1538_p5 }
 0x1c3   :  { %1546 = shalt.err (!%p1543_p7)
}
 0x1c4   :  { %952 = dma.vmem_to_hbm [thread:$0]  %s950_s23, 16, %s1941_s5, [#allocation4]  }
 0x1c5   :  { %1547 = dma.done.wait [#allocation4], 16  }
 0x1c6   :  { %1548 = vsyncadd [#allocation4], 4294967280 }
 0x1c7   :  { %956 = vsyncpa [#allocation4], 1 }

</bundles_post_ra>
